<compile_context>
chip_gen: v7x
topology: tpu7x:2x2x1
jax: 0.10.0
libtpu: 0.0.40
codegen_flags: <defaults>
</compile_context>

<pallas_src>
import functools

import jax
import jax.numpy as jnp
import numpy as np
from jax.experimental import pallas as pl
from jax.experimental.pallas import tpu as pltpu

_OUT_LANES = 128  # lane-dense output row: [fl, cb, ce_num, ce_den, I_0..I_{C-1}, O_0.., L_0..]


def _sum_all_loss_kernel(
    alpha_ref,      # (C,1) f32 VMEM  — alpha weights (CE + FocalLoss)
    wcb_ref,        # (C,1) f32 VMEM  — class-balanced weights
    label_ref,      # (1,1,TN) i32
    prob_ref,       # (1,C,TN) f32 (already softmaxed over C)
    out_ref,        # (1,1,128) f32   — per-batch-row partial sums
    fl_acc, cb_acc, ce_num_acc, ce_den_acc,   # (1,TN) f32 VMEM scratch
    inter_acc, psq_acc, cnt_acc,              # (C,TN) f32 VMEM scratch
    *, num_class, gamma, hw, tile_n,
):
    C = num_class
    i = pl.program_id(1)   # tile axis (inner, "arbitrary")

    @pl.when(i == 0)
    def _():
        fl_acc[...] = jnp.zeros_like(fl_acc)
        cb_acc[...] = jnp.zeros_like(cb_acc)
        ce_num_acc[...] = jnp.zeros_like(ce_num_acc)
        ce_den_acc[...] = jnp.zeros_like(ce_den_acc)
        inter_acc[...] = jnp.zeros_like(inter_acc)
        psq_acc[...] = jnp.zeros_like(psq_acc)
        cnt_acc[...] = jnp.zeros_like(cnt_acc)

    prob = prob_ref[0]     # (C, TN)
    lab = label_ref[0]     # (1, TN) int32

    # ---- in-kernel tail mask (replaces jnp.pad in HBM) ----
    lane = jax.lax.broadcasted_iota(jnp.int32, (1, tile_n), 1)
    mask = lane < (hw - i * tile_n)                 # (1, TN) bool
    probm = jnp.where(mask, prob, 0.0)              # (C, TN)
    labm = jnp.where(mask, lab, -1)                 # (1, TN)

    cls = jax.lax.broadcasted_iota(jnp.int32, (C, tile_n), 0)
    onehot = (labm == cls).astype(jnp.float32)      # (C, TN)

    # ---- select target-class probability & weights once per pixel ----
    p_sel = jnp.sum(onehot * probm, axis=0, keepdims=True)          # (1, TN)
    a_sel = jnp.sum(onehot * alpha_ref[...], axis=0, keepdims=True) # (1, TN)
    w_sel = jnp.sum(onehot * wcb_ref[...], axis=0, keepdims=True)   # (1, TN)

    p_safe = jnp.where(mask, p_sel, 1.0)
    neg_log_p = -jnp.log(p_safe)
    one_m = 1.0 - p_safe
    if float(gamma) == 2.0:
        focal = one_m * one_m                       # VPU, no EUP pow
    else:
        focal = jnp.power(one_m, jnp.float32(gamma))
    focal_ce = focal * neg_log_p                    # shared by FL and CB

    fl_acc[...] += a_sel * focal_ce
    cb_acc[...] += w_sel * focal_ce

    # ---- weighted CE: torch CE applies log_softmax to `prob` again ----
    lse = jnp.log(jnp.sum(jnp.exp(probm), axis=0, keepdims=True))   # (1, TN)
    ce_num_acc[...] += a_sel * (lse - p_sel)
    ce_den_acc[...] += a_sel

    # ---- Dice partial sums (per class, global) ----
    inter_acc[...] += onehot * probm
    psq_acc[...] += probm * probm
    cnt_acc[...] += onehot

    @pl.when(i == pl.num_programs(1) - 1)
    def _():
        vals = [
            jnp.sum(fl_acc[...]),
            jnp.sum(cb_acc[...]),
            jnp.sum(ce_num_acc[...]),
            jnp.sum(ce_den_acc[...]),
        ]
        for c in range(C):
            vals.append(jnp.sum(inter_acc[pl.ds(c, 1), :]))
        for c in range(C):
            vals.append(jnp.sum(psq_acc[pl.ds(c, 1), :]))
        for c in range(C):
            vals.append(jnp.sum(cnt_acc[pl.ds(c, 1), :]))

        out_lane = jax.lax.broadcasted_iota(jnp.int32, (1, _OUT_LANES), 1)
        vec = jnp.zeros((1, _OUT_LANES), jnp.float32)
        for j, v in enumerate(vals):
            vec = jnp.where(out_lane == j, v, vec)
        out_ref[0] = vec


def sum_all_loss(
    prob,                     # (B, C, H, W) float32, already softmaxed over C
    label,                    # (B, H, W) integer labels
    *,
    lambda_list,              # [lambda_ce, lambda_fl, lambda_dl, lambda_cb]
    alpha,                    # per-class alpha weights (len C)
    beta: float = 0.999,
    gamma: float = 2.0,
    sample_per_class=(20, 75, 5),
    dice_smooth: float = 1e-5,
    num_class: int = 3,
    reduction: str = "mean",
    tile_n: int = 2048,
):
    B, C, H, W = prob.shape
    assert C == num_class and len(alpha) == C and len(sample_per_class) == C
    assert label.shape == (B, H, W)
    assert 4 + 3 * C <= _OUT_LANES

    # ---- class-balanced weights (mirrors ClassBalancedLoss.__get_weights) ----
    eff = 1.0 - np.power(beta, np.asarray(sample_per_class, np.float64))
    wcb = (1.0 - beta) / eff
    wcb = wcb / np.sum(wcb) * C

    alpha_col = jnp.asarray(alpha, jnp.float32).reshape(C, 1)
    wcb_col = jnp.asarray(wcb, jnp.float32).reshape(C, 1)

    # ---- free reshapes only (no transpose, no pad) ----
    HW = H * W
    prob3 = prob.reshape(B, C, HW)
    label3 = label.reshape(B, 1, HW).astype(jnp.int32)

    tile_n = max(128, (int(tile_n) // 128) * 128)
    if HW <= tile_n:
        tn_eff, grid_n = HW, 1
    else:
        tn_eff, grid_n = tile_n, pl.cdiv(HW, tile_n)

    kernel = functools.partial(
        _sum_all_loss_kernel, num_class=C, gamma=float(gamma), hw=HW, tile_n=tn_eff)

    parts = pl.pallas_call(
        kernel,
        out_shape=jax.ShapeDtypeStruct((B, 1, _OUT_LANES), jnp.float32),
        grid_spec=pltpu.PrefetchScalarGridSpec(
            num_scalar_prefetch=0,
            grid=(B, grid_n),
            in_specs=[
                pl.BlockSpec((C, 1), lambda b, i: (0, 0)),              # alpha   (resident)
                pl.BlockSpec((C, 1), lambda b, i: (0, 0)),              # cb wts  (resident)
                pl.BlockSpec((1, 1, tn_eff), lambda b, i: (b, 0, i)),   # label
                pl.BlockSpec((1, C, tn_eff), lambda b, i: (b, 0, i)),   # prob
            ],
            out_specs=pl.BlockSpec((1, 1, _OUT_LANES), lambda b, i: (b, 0, 0)),
            scratch_shapes=[
                pltpu.VMEM((1, tn_eff), jnp.float32),   # fl partial
                pltpu.VMEM((1, tn_eff), jnp.float32),   # cb partial
                pltpu.VMEM((1, tn_eff), jnp.float32),   # ce numerator partial
                pltpu.VMEM((1, tn_eff), jnp.float32),   # ce denominator partial
                pltpu.VMEM((C, tn_eff), jnp.float32),   # dice intersect per class
                pltpu.VMEM((C, tn_eff), jnp.float32),   # dice sum(prob^2) per class
                pltpu.VMEM((C, tn_eff), jnp.float32),   # dice label count per class
            ],
        ),
        compiler_params=pltpu.CompilerParams(
            dimension_semantics=("parallel", "arbitrary")),
    )(alpha_col, wcb_col, label3, prob3)

    # ---- finalize (tiny) in plain JAX ----
    tot = jnp.sum(parts[:, 0, :], axis=0)           # sum per-batch-row partials
    fl_sum, cb_sum, ce_num, ce_den = tot[0], tot[1], tot[2], tot[3]
    inter = tot[4:4 + C]
    psq = tot[4 + C:4 + 2 * C]
    cnt = tot[4 + 2 * C:4 + 3 * C]

    n_pix = jnp.float32(B * HW)
    if reduction == "sum":
        fl_loss, cb_loss = fl_sum, cb_sum
    else:
        # TODO(synk): reduction='none' would need a per-pixel output map; only mean/sum supported.
        fl_loss, cb_loss = fl_sum / n_pix, cb_sum / n_pix
    ce_loss = ce_num / ce_den                       # torch CE weighted mean
    dice = (2.0 * inter + dice_smooth) / (psq + cnt + dice_smooth)
    dl_loss = jnp.mean(1.0 - dice)
    # TODO(synk): DiceLoss.forward's per-class print() debug side effect is not replicated.

    lam_ce, lam_fl, lam_dl, lam_cb = (float(x) for x in lambda_list)
    return lam_ce * ce_loss + lam_fl * fl_loss + lam_dl * dl_loss + lam_cb * cb_loss


def _reference_sum_all_loss(prob, label, *, lambda_list, alpha, beta, gamma,
                            sample_per_class, dice_smooth, num_class):
    """Pure-JAX reference matching the PyTorch SumAllLoss forward (reduction='mean')."""
    B, C, H, W = prob.shape
    alpha_v = jnp.asarray(alpha, jnp.float32).reshape(1, C, 1, 1)
    onehot = jax.nn.one_hot(label, C, axis=1, dtype=jnp.float32)

    # CE (applies log_softmax to the already-softmaxed prob, weighted mean)
    logp = jax.nn.log_softmax(prob, axis=1)
    a_map = jnp.sum(onehot * alpha_v, axis=1)
    ce_map = -jnp.sum(onehot * logp, axis=1)
    ce_loss = jnp.sum(a_map * ce_map) / jnp.sum(a_map)

    focal = jnp.power(1.0 - prob, gamma) * (-jnp.log(prob))
    fl_loss = jnp.mean(jnp.sum(alpha_v * onehot * focal, axis=1))

    inter = jnp.sum(prob * onehot, axis=(0, 2, 3))
    psq = jnp.sum(prob * prob, axis=(0, 2, 3))
    cnt = jnp.sum(onehot, axis=(0, 2, 3))
    dice = (2.0 * inter + dice_smooth) / (psq + cnt + dice_smooth)
    dl_loss = jnp.mean(1.0 - dice)

    eff = 1.0 - np.power(beta, np.asarray(sample_per_class, np.float64))
    wcb = (1.0 - beta) / eff
    wcb = jnp.asarray(wcb / np.sum(wcb) * C, jnp.float32).reshape(1, C, 1, 1)
    cb_loss = jnp.mean(jnp.sum(wcb * onehot * focal, axis=1))

    lam_ce, lam_fl, lam_dl, lam_cb = lambda_list
    return lam_ce * ce_loss + lam_fl * fl_loss + lam_dl * dl_loss + lam_cb * cb_loss


if __name__ == "__main__":
    key = jax.random.PRNGKey(0)
    k_logits, k_label = jax.random.split(key)

    B, C, H, W = 2, 3, 16, 16
    lambda_list = [0.25, 0.25, 0.25, 0.25]
    alpha = [0.2, 0.3, 0.5]
    beta, gamma = 0.999, 2.0
    sample_per_class = [20, 75, 5]
    dice_smooth = 1e-5

    logits = jax.random.normal(k_logits, (B, C, H, W), dtype=jnp.float32)
    prob = jax.nn.softmax(logits, axis=1)
    label = jax.random.randint(k_label, (B, H, W), 0, C, dtype=jnp.int32)

    out = sum_all_loss(
        prob, label, lambda_list=lambda_list, alpha=alpha, beta=beta, gamma=gamma,
        sample_per_class=sample_per_class, dice_smooth=dice_smooth, num_class=C)
    out = jax.block_until_ready(out)
    ref = _reference_sum_all_loss(
        prob, label, lambda_list=lambda_list, alpha=alpha, beta=beta, gamma=gamma,
        sample_per_class=sample_per_class, dice_smooth=dice_smooth, num_class=C)
    assert jnp.allclose(out, ref, rtol=1e-4, atol=1e-5), (out, ref)

    # Second check: non-divisible spatial size with multiple tiles -> exercises
    # the multi-tile accumulation path and the in-kernel tail masking.
    H2, W2 = 20, 20
    logits2 = jax.random.normal(jax.random.PRNGKey(1), (B, C, H2, W2), dtype=jnp.float32)
    prob2 = jax.nn.softmax(logits2, axis=1)
    label2 = jax.random.randint(jax.random.PRNGKey(2), (B, H2, W2), 0, C, dtype=jnp.int32)
    out2 = sum_all_loss(
        prob2, label2, lambda_list=lambda_list, alpha=alpha, beta=beta, gamma=gamma,
        sample_per_class=sample_per_class, dice_smooth=dice_smooth, num_class=C,
        tile_n=256)
    out2 = jax.block_until_ready(out2)
    ref2 = _reference_sum_all_loss(
        prob2, label2, lambda_list=lambda_list, alpha=alpha, beta=beta, gamma=gamma,
        sample_per_class=sample_per_class, dice_smooth=dice_smooth, num_class=C)
    assert jnp.allclose(out2, ref2, rtol=1e-4, atol=1e-5), (out2, ref2)

    print("KERNEL_OK")
</pallas_src>

<mosaic_0001>
module attributes {stable_mosaic.version = 11 : i64} {
  func.func @_sum_all_loss_kernel(%arg0: i32, %arg1: i32, %arg2: memref<3x1xf32, #tpu.memory_space<vmem>>, %arg3: memref<3x1xf32, #tpu.memory_space<vmem>>, %arg4: memref<1x1x256xi32, #tpu.memory_space<vmem>>, %arg5: memref<1x3x256xf32, #tpu.memory_space<vmem>>, %arg6: memref<1x1x128xf32, #tpu.memory_space<vmem>>, %arg7: memref<1x256xf32, #tpu.memory_space<vmem>>, %arg8: memref<1x256xf32, #tpu.memory_space<vmem>>, %arg9: memref<1x256xf32, #tpu.memory_space<vmem>>, %arg10: memref<1x256xf32, #tpu.memory_space<vmem>>, %arg11: memref<3x256xf32, #tpu.memory_space<vmem>>, %arg12: memref<3x256xf32, #tpu.memory_space<vmem>>, %arg13: memref<3x256xf32, #tpu.memory_space<vmem>>) attributes {dimension_semantics = [#tpu.dimension_semantics<parallel>, #tpu.dimension_semantics<arbitrary>], iteration_bounds = array<i64: 2, 1>, scalar_prefetch = 0 : i64, scratch_operands = 7 : i64, tpu.core_type = #tpu.core_type<tc>, window_params = [{pipeline_mode = #tpu.pipeline_mode<synchronous>, transform_indices = @transform_0, window_bounds = array<i64: 3, 1>}, {pipeline_mode = #tpu.pipeline_mode<synchronous>, transform_indices = @transform_1, window_bounds = array<i64: 3, 1>}, {transform_indices = @transform_2, window_bounds = array<i64: 1, 1, 256>}, {transform_indices = @transform_3, window_bounds = array<i64: 1, 3, 256>}, {transform_indices = @transform_4, window_bounds = array<i64: 1, 1, 128>}]} {
    %c0_i32 = arith.constant 0 : i32
    %0 = arith.cmpi eq, %arg1, %c0_i32 : i32
    %1 = arith.extui %0 : i1 to i32
    %c0_i32_0 = arith.constant 0 : i32
    %2 = arith.cmpi ne, %1, %c0_i32_0 : i32
    scf.if %2 {
      %cst_48 = arith.constant 0.000000e+00 : f32
      %79 = vector.broadcast %cst_48 : f32 to vector<1x256xf32>
      %c0_49 = arith.constant 0 : index
      %c0_50 = arith.constant 0 : index
      %80 = vector.load %arg7[%c0_49, %c0_50] : memref<1x256xf32, #tpu.memory_space<vmem>>, vector<1x256xf32>
      tpu.vector_store %arg7[%c0_49, %c0_50], %79 {strides = array<i32>} : memref<1x256xf32, #tpu.memory_space<vmem>>, vector<1x256xf32>,
      %cst_51 = arith.constant 0.000000e+00 : f32
      %81 = vector.broadcast %cst_51 : f32 to vector<1x256xf32>
      %c0_52 = arith.constant 0 : index
      %c0_53 = arith.constant 0 : index
      %82 = vector.load %arg8[%c0_52, %c0_53] : memref<1x256xf32, #tpu.memory_space<vmem>>, vector<1x256xf32>
      tpu.vector_store %arg8[%c0_52, %c0_53], %81 {strides = array<i32>} : memref<1x256xf32, #tpu.memory_space<vmem>>, vector<1x256xf32>,
      %cst_54 = arith.constant 0.000000e+00 : f32
      %83 = vector.broadcast %cst_54 : f32 to vector<1x256xf32>
      %c0_55 = arith.constant 0 : index
      %c0_56 = arith.constant 0 : index
      %84 = vector.load %arg9[%c0_55, %c0_56] : memref<1x256xf32, #tpu.memory_space<vmem>>, vector<1x256xf32>
      tpu.vector_store %arg9[%c0_55, %c0_56], %83 {strides = array<i32>} : memref<1x256xf32, #tpu.memory_space<vmem>>, vector<1x256xf32>,
      %cst_57 = arith.constant 0.000000e+00 : f32
      %85 = vector.broadcast %cst_57 : f32 to vector<1x256xf32>
      %c0_58 = arith.constant 0 : index
      %c0_59 = arith.constant 0 : index
      %86 = vector.load %arg10[%c0_58, %c0_59] : memref<1x256xf32, #tpu.memory_space<vmem>>, vector<1x256xf32>
      tpu.vector_store %arg10[%c0_58, %c0_59], %85 {strides = array<i32>} : memref<1x256xf32, #tpu.memory_space<vmem>>, vector<1x256xf32>,
      %cst_60 = arith.constant 0.000000e+00 : f32
      %87 = vector.broadcast %cst_60 : f32 to vector<3x256xf32>
      %c0_61 = arith.constant 0 : index
      %c0_62 = arith.constant 0 : index
      %88 = vector.load %arg11[%c0_61, %c0_62] : memref<3x256xf32, #tpu.memory_space<vmem>>, vector<3x256xf32>
      tpu.vector_store %arg11[%c0_61, %c0_62], %87 {strides = array<i32>} : memref<3x256xf32, #tpu.memory_space<vmem>>, vector<3x256xf32>,
      %cst_63 = arith.constant 0.000000e+00 : f32
      %89 = vector.broadcast %cst_63 : f32 to vector<3x256xf32>
      %c0_64 = arith.constant 0 : index
      %c0_65 = arith.constant 0 : index
      %90 = vector.load %arg12[%c0_64, %c0_65] : memref<3x256xf32, #tpu.memory_space<vmem>>, vector<3x256xf32>
      tpu.vector_store %arg12[%c0_64, %c0_65], %89 {strides = array<i32>} : memref<3x256xf32, #tpu.memory_space<vmem>>, vector<3x256xf32>,
      %cst_66 = arith.constant 0.000000e+00 : f32
      %91 = vector.broadcast %cst_66 : f32 to vector<3x256xf32>
      %c0_67 = arith.constant 0 : index
      %c0_68 = arith.constant 0 : index
      %92 = vector.load %arg13[%c0_67, %c0_68] : memref<3x256xf32, #tpu.memory_space<vmem>>, vector<3x256xf32>
      tpu.vector_store %arg13[%c0_67, %c0_68], %91 {strides = array<i32>} : memref<3x256xf32, #tpu.memory_space<vmem>>, vector<3x256xf32>,
    } else {
    }
    %c0 = arith.constant 0 : index
    %c0_1 = arith.constant 0 : index
    %c0_2 = arith.constant 0 : index
    %3 = vector.load %arg5[%c0, %c0_1, %c0_2] : memref<1x3x256xf32, #tpu.memory_space<vmem>>, vector<1x3x256xf32>
    %4 = vector.shape_cast %3 : vector<1x3x256xf32> to vector<3x256xf32>
    %c0_3 = arith.constant 0 : index
    %c0_4 = arith.constant 0 : index
    %c0_5 = arith.constant 0 : index
    %5 = vector.load %arg4[%c0_3, %c0_4, %c0_5] : memref<1x1x256xi32, #tpu.memory_space<vmem>>, vector<1x1x256xi32>
    %6 = vector.shape_cast %5 : vector<1x1x256xi32> to vector<1x256xi32>
    %7 = tpu.iota {dimensions = array<i32: 1>} : vector<1x256xi32>
    %c256_i32 = arith.constant 256 : i32
    %8 = arith.muli %arg1, %c256_i32 : i32
    %c256_i32_6 = arith.constant 256 : i32
    %9 = arith.subi %c256_i32_6, %8 : i32
    %10 = vector.broadcast %9 : i32 to vector<1x256xi32>
    %11 = arith.cmpi slt, %7, %10 : vector<1x256xi32>
    %cst = arith.constant 0.000000e+00 : f32
    %12 = vector.shape_cast %11 : vector<1x256xi1> to vector<1x256xi1>
    %13 = vector.broadcast %12 : vector<1x256xi1> to vector<3x256xi1>
    %14 = vector.broadcast %cst : f32 to vector<3x256xf32>
    %15 = arith.select %13, %4, %14 : vector<3x256xi1>, vector<3x256xf32>
    %c-1_i32 = arith.constant -1 : i32
    %16 = vector.broadcast %c-1_i32 : i32 to vector<1x256xi32>
    %17 = arith.select %11, %6, %16 : vector<1x256xi1>, vector<1x256xi32>
    %18 = tpu.iota {dimensions = array<i32: 0>} : vector<3x256xi32>
    %19 = vector.broadcast %17 : vector<1x256xi32> to vector<3x256xi32>
    %20 = arith.cmpi eq, %19, %18 : vector<3x256xi32>
    %21 = arith.extui %20 : vector<3x256xi1> to vector<3x256xi32>
    %22 = arith.sitofp %21 : vector<3x256xi32> to vector<3x256xf32>
    %23 = arith.mulf %22, %15 : vector<3x256xf32>
    %cst_7 = arith.constant dense<0.000000e+00> : vector<256xf32>
    %24 = vector.multi_reduction <add>, %23, %cst_7 [0] : vector<3x256xf32> to vector<256xf32>
    %25 = vector.shape_cast %24 : vector<256xf32> to vector<1x256xf32>
    %c0_8 = arith.constant 0 : index
    %c0_9 = arith.constant 0 : index
    %26 = vector.load %arg2[%c0_8, %c0_9] : memref<3x1xf32, #tpu.memory_space<vmem>>, vector<3x1xf32>
    %27 = vector.broadcast %26 : vector<3x1xf32> to vector<3x256xf32>
    %28 = arith.mulf %22, %27 : vector<3x256xf32>
    %cst_10 = arith.constant dense<0.000000e+00> : vector<256xf32>
    %29 = vector.multi_reduction <add>, %28, %cst_10 [0] : vector<3x256xf32> to vector<256xf32>
    %30 = vector.shape_cast %29 : vector<256xf32> to vector<1x256xf32>
    %c0_11 = arith.constant 0 : index
    %c0_12 = arith.constant 0 : index
    %31 = vector.load %arg3[%c0_11, %c0_12] : memref<3x1xf32, #tpu.memory_space<vmem>>, vector<3x1xf32>
    %32 = vector.broadcast %31 : vector<3x1xf32> to vector<3x256xf32>
    %33 = arith.mulf %22, %32 : vector<3x256xf32>
    %cst_13 = arith.constant dense<0.000000e+00> : vector<256xf32>
    %34 = vector.multi_reduction <add>, %33, %cst_13 [0] : vector<3x256xf32> to vector<256xf32>
    %35 = vector.shape_cast %34 : vector<256xf32> to vector<1x256xf32>
    %cst_14 = arith.constant 1.000000e+00 : f32
    %36 = vector.broadcast %cst_14 : f32 to vector<1x256xf32>
    %37 = arith.select %11, %25, %36 : vector<1x256xi1>, vector<1x256xf32>
    %38 = math.log %37 : vector<1x256xf32>
    %cst_15 = arith.constant 0.000000e+00 : f32
    %39 = vector.broadcast %cst_15 : f32 to vector<1x256xf32>
    %40 = arith.subf %39, %38 : vector<1x256xf32>
    %cst_16 = arith.constant 1.000000e+00 : f32
    %41 = vector.broadcast %cst_16 : f32 to vector<1x256xf32>
    %42 = arith.subf %41, %37 : vector<1x256xf32>
    %43 = arith.mulf %42, %42 : vector<1x256xf32>
    %44 = arith.mulf %43, %40 : vector<1x256xf32>
    %c0_17 = arith.constant 0 : index
    %c0_18 = arith.constant 0 : index
    %45 = vector.load %arg7[%c0_17, %c0_18] : memref<1x256xf32, #tpu.memory_space<vmem>>, vector<1x256xf32>
    %46 = arith.mulf %30, %44 : vector<1x256xf32>
    %47 = arith.addf %45, %46 : vector<1x256xf32>
    %c0_19 = arith.constant 0 : index
    %c0_20 = arith.constant 0 : index
    %48 = vector.load %arg7[%c0_19, %c0_20] : memref<1x256xf32, #tpu.memory_space<vmem>>, vector<1x256xf32>
    tpu.vector_store %arg7[%c0_19, %c0_20], %47 {strides = array<i32>} : memref<1x256xf32, #tpu.memory_space<vmem>>, vector<1x256xf32>,
    %c0_21 = arith.constant 0 : index
    %c0_22 = arith.constant 0 : index
    %49 = vector.load %arg8[%c0_21, %c0_22] : memref<1x256xf32, #tpu.memory_space<vmem>>, vector<1x256xf32>
    %50 = arith.mulf %35, %44 : vector<1x256xf32>
    %51 = arith.addf %49, %50 : vector<1x256xf32>
    %c0_23 = arith.constant 0 : index
    %c0_24 = arith.constant 0 : index
    %52 = vector.load %arg8[%c0_23, %c0_24] : memref<1x256xf32, #tpu.memory_space<vmem>>, vector<1x256xf32>
    tpu.vector_store %arg8[%c0_23, %c0_24], %51 {strides = array<i32>} : memref<1x256xf32, #tpu.memory_space<vmem>>, vector<1x256xf32>,
    %53 = math.exp %15 : vector<3x256xf32>
    %cst_25 = arith.constant dense<0.000000e+00> : vector<256xf32>
    %54 = vector.multi_reduction <add>, %53, %cst_25 [0] : vector<3x256xf32> to vector<256xf32>
    %55 = vector.shape_cast %54 : vector<256xf32> to vector<1x256xf32>
    %56 = math.log %55 : vector<1x256xf32>
    %c0_26 = arith.constant 0 : index
    %c0_27 = arith.constant 0 : index
    %57 = vector.load %arg9[%c0_26, %c0_27] : memref<1x256xf32, #tpu.memory_space<vmem>>, vector<1x256xf32>
    %58 = arith.subf %56, %25 : vector<1x256xf32>
    %59 = arith.mulf %30, %58 : vector<1x256xf32>
    %60 = arith.addf %57, %59 : vector<1x256xf32>
    %c0_28 = arith.constant 0 : index
    %c0_29 = arith.constant 0 : index
    %61 = vector.load %arg9[%c0_28, %c0_29] : memref<1x256xf32, #tpu.memory_space<vmem>>, vector<1x256xf32>
    tpu.vector_store %arg9[%c0_28, %c0_29], %60 {strides = array<i32>} : memref<1x256xf32, #tpu.memory_space<vmem>>, vector<1x256xf32>,
    %c0_30 = arith.constant 0 : index
    %c0_31 = arith.constant 0 : index
    %62 = vector.load %arg10[%c0_30, %c0_31] : memref<1x256xf32, #tpu.memory_space<vmem>>, vector<1x256xf32>
    %63 = arith.addf %62, %30 : vector<1x256xf32>
    %c0_32 = arith.constant 0 : index
    %c0_33 = arith.constant 0 : index
    %64 = vector.load %arg10[%c0_32, %c0_33] : memref<1x256xf32, #tpu.memory_space<vmem>>, vector<1x256xf32>
    tpu.vector_store %arg10[%c0_32, %c0_33], %63 {strides = array<i32>} : memref<1x256xf32, #tpu.memory_space<vmem>>, vector<1x256xf32>,
    %c0_34 = arith.constant 0 : index
    %c0_35 = arith.constant 0 : index
    %65 = vector.load %arg11[%c0_34, %c0_35] : memref<3x256xf32, #tpu.memory_space<vmem>>, vector<3x256xf32>
    %66 = arith.mulf %22, %15 : vector<3x256xf32>
    %67 = arith.addf %65, %66 : vector<3x256xf32>
    %c0_36 = arith.constant 0 : index
    %c0_37 = arith.constant 0 : index
    %68 = vector.load %arg11[%c0_36, %c0_37] : memref<3x256xf32, #tpu.memory_space<vmem>>, vector<3x256xf32>
    tpu.vector_store %arg11[%c0_36, %c0_37], %67 {strides = array<i32>} : memref<3x256xf32, #tpu.memory_space<vmem>>, vector<3x256xf32>,
    %c0_38 = arith.constant 0 : index
    %c0_39 = arith.constant 0 : index
    %69 = vector.load %arg12[%c0_38, %c0_39] : memref<3x256xf32, #tpu.memory_space<vmem>>, vector<3x256xf32>
    %70 = arith.mulf %15, %15 : vector<3x256xf32>
    %71 = arith.addf %69, %70 : vector<3x256xf32>
    %c0_40 = arith.constant 0 : index
    %c0_41 = arith.constant 0 : index
    %72 = vector.load %arg12[%c0_40, %c0_41] : memref<3x256xf32, #tpu.memory_space<vmem>>, vector<3x256xf32>
    tpu.vector_store %arg12[%c0_40, %c0_41], %71 {strides = array<i32>} : memref<3x256xf32, #tpu.memory_space<vmem>>, vector<3x256xf32>,
    %c0_42 = arith.constant 0 : index
    %c0_43 = arith.constant 0 : index
    %73 = vector.load %arg13[%c0_42, %c0_43] : memref<3x256xf32, #tpu.memory_space<vmem>>, vector<3x256xf32>
    %74 = arith.addf %73, %22 : vector<3x256xf32>
    %c0_44 = arith.constant 0 : index
    %c0_45 = arith.constant 0 : index
    %75 = vector.load %arg13[%c0_44, %c0_45] : memref<3x256xf32, #tpu.memory_space<vmem>>, vector<3x256xf32>
    tpu.vector_store %arg13[%c0_44, %c0_45], %74 {strides = array<i32>} : memref<3x256xf32, #tpu.memory_space<vmem>>, vector<3x256xf32>,
    %c0_i32_46 = arith.constant 0 : i32
    %76 = arith.cmpi eq, %arg1, %c0_i32_46 : i32
    %77 = arith.extui %76 : i1 to i32
    %c0_i32_47 = arith.constant 0 : i32
    %78 = arith.cmpi ne, %77, %c0_i32_47 : i32
    scf.if %78 {
      %c0_48 = arith.constant 0 : index
      %c0_49 = arith.constant 0 : index
      %79 = vector.load %arg7[%c0_48, %c0_49] : memref<1x256xf32, #tpu.memory_space<vmem>>, vector<1x256xf32>
      %80 = vector.shape_cast %79 : vector<1x256xf32> to vector<1x1x256xf32>
      %cst_50 = arith.constant dense<0.000000e+00> : vector<1xf32>
      %81 = vector.multi_reduction <add>, %80, %cst_50 [1, 2] : vector<1x1x256xf32> to vector<1xf32>
      %82 = vector.shape_cast %81 : vector<1xf32> to vector<1x1x1xf32>
      %83 = vector.extract %82[0, 0, 0] : f32 from vector<1x1x1xf32>
      %c0_51 = arith.constant 0 : index
      %c0_52 = arith.constant 0 : index
      %84 = vector.load %arg8[%c0_51, %c0_52] : memref<1x256xf32, #tpu.memory_space<vmem>>, vector<1x256xf32>
      %85 = vector.shape_cast %84 : vector<1x256xf32> to vector<1x1x256xf32>
      %cst_53 = arith.constant dense<0.000000e+00> : vector<1xf32>
      %86 = vector.multi_reduction <add>, %85, %cst_53 [1, 2] : vector<1x1x256xf32> to vector<1xf32>
      %87 = vector.shape_cast %86 : vector<1xf32> to vector<1x1x1xf32>
      %88 = vector.extract %87[0, 0, 0] : f32 from vector<1x1x1xf32>
      %c0_54 = arith.constant 0 : index
      %c0_55 = arith.constant 0 : index
      %89 = vector.load %arg9[%c0_54, %c0_55] : memref<1x256xf32, #tpu.memory_space<vmem>>, vector<1x256xf32>
      %90 = vector.shape_cast %89 : vector<1x256xf32> to vector<1x1x256xf32>
      %cst_56 = arith.constant dense<0.000000e+00> : vector<1xf32>
      %91 = vector.multi_reduction <add>, %90, %cst_56 [1, 2] : vector<1x1x256xf32> to vector<1xf32>
      %92 = vector.shape_cast %91 : vector<1xf32> to vector<1x1x1xf32>
      %93 = vector.extract %92[0, 0, 0] : f32 from vector<1x1x1xf32>
      %c0_57 = arith.constant 0 : index
      %c0_58 = arith.constant 0 : index
      %94 = vector.load %arg10[%c0_57, %c0_58] : memref<1x256xf32, #tpu.memory_space<vmem>>, vector<1x256xf32>
      %95 = vector.shape_cast %94 : vector<1x256xf32> to vector<1x1x256xf32>
      %cst_59 = arith.constant dense<0.000000e+00> : vector<1xf32>
      %96 = vector.multi_reduction <add>, %95, %cst_59 [1, 2] : vector<1x1x256xf32> to vector<1xf32>
      %97 = vector.shape_cast %96 : vector<1xf32> to vector<1x1x1xf32>
      %98 = vector.extract %97[0, 0, 0] : f32 from vector<1x1x1xf32>
      %c0_60 = arith.constant 0 : index
      %c0_61 = arith.constant 0 : index
      %99 = vector.load %arg11[%c0_60, %c0_61] : memref<3x256xf32, #tpu.memory_space<vmem>>, vector<1x256xf32>
      %100 = vector.shape_cast %99 : vector<1x256xf32> to vector<1x1x256xf32>
      %cst_62 = arith.constant dense<0.000000e+00> : vector<1xf32>
      %101 = vector.multi_reduction <add>, %100, %cst_62 [1, 2] : vector<1x1x256xf32> to vector<1xf32>
      %102 = vector.shape_cast %101 : vector<1xf32> to vector<1x1x1xf32>
      %103 = vector.extract %102[0, 0, 0] : f32 from vector<1x1x1xf32>
      %c1 = arith.constant 1 : index
      %c0_63 = arith.constant 0 : index
      %104 = vector.load %arg11[%c1, %c0_63] : memref<3x256xf32, #tpu.memory_space<vmem>>, vector<1x256xf32>
      %105 = vector.shape_cast %104 : vector<1x256xf32> to vector<1x1x256xf32>
      %cst_64 = arith.constant dense<0.000000e+00> : vector<1xf32>
      %106 = vector.multi_reduction <add>, %105, %cst_64 [1, 2] : vector<1x1x256xf32> to vector<1xf32>
      %107 = vector.shape_cast %106 : vector<1xf32> to vector<1x1x1xf32>
      %108 = vector.extract %107[0, 0, 0] : f32 from vector<1x1x1xf32>
      %c2 = arith.constant 2 : index
      %c0_65 = arith.constant 0 : index
      %109 = vector.load %arg11[%c2, %c0_65] : memref<3x256xf32, #tpu.memory_space<vmem>>, vector<1x256xf32>
      %110 = vector.shape_cast %109 : vector<1x256xf32> to vector<1x1x256xf32>
      %cst_66 = arith.constant dense<0.000000e+00> : vector<1xf32>
      %111 = vector.multi_reduction <add>, %110, %cst_66 [1, 2] : vector<1x1x256xf32> to vector<1xf32>
      %112 = vector.shape_cast %111 : vector<1xf32> to vector<1x1x1xf32>
      %113 = vector.extract %112[0, 0, 0] : f32 from vector<1x1x1xf32>
      %c0_67 = arith.constant 0 : index
      %c0_68 = arith.constant 0 : index
      %114 = vector.load %arg12[%c0_67, %c0_68] : memref<3x256xf32, #tpu.memory_space<vmem>>, vector<1x256xf32>
      %115 = vector.shape_cast %114 : vector<1x256xf32> to vector<1x1x256xf32>
      %cst_69 = arith.constant dense<0.000000e+00> : vector<1xf32>
      %116 = vector.multi_reduction <add>, %115, %cst_69 [1, 2] : vector<1x1x256xf32> to vector<1xf32>
      %117 = vector.shape_cast %116 : vector<1xf32> to vector<1x1x1xf32>
      %118 = vector.extract %117[0, 0, 0] : f32 from vector<1x1x1xf32>
      %c1_70 = arith.constant 1 : index
      %c0_71 = arith.constant 0 : index
      %119 = vector.load %arg12[%c1_70, %c0_71] : memref<3x256xf32, #tpu.memory_space<vmem>>, vector<1x256xf32>
      %120 = vector.shape_cast %119 : vector<1x256xf32> to vector<1x1x256xf32>
      %cst_72 = arith.constant dense<0.000000e+00> : vector<1xf32>
      %121 = vector.multi_reduction <add>, %120, %cst_72 [1, 2] : vector<1x1x256xf32> to vector<1xf32>
      %122 = vector.shape_cast %121 : vector<1xf32> to vector<1x1x1xf32>
      %123 = vector.extract %122[0, 0, 0] : f32 from vector<1x1x1xf32>
      %c2_73 = arith.constant 2 : index
      %c0_74 = arith.constant 0 : index
      %124 = vector.load %arg12[%c2_73, %c0_74] : memref<3x256xf32, #tpu.memory_space<vmem>>, vector<1x256xf32>
      %125 = vector.shape_cast %124 : vector<1x256xf32> to vector<1x1x256xf32>
      %cst_75 = arith.constant dense<0.000000e+00> : vector<1xf32>
      %126 = vector.multi_reduction <add>, %125, %cst_75 [1, 2] : vector<1x1x256xf32> to vector<1xf32>
      %127 = vector.shape_cast %126 : vector<1xf32> to vector<1x1x1xf32>
      %128 = vector.extract %127[0, 0, 0] : f32 from vector<1x1x1xf32>
      %c0_76 = arith.constant 0 : index
      %c0_77 = arith.constant 0 : index
      %129 = vector.load %arg13[%c0_76, %c0_77] : memref<3x256xf32, #tpu.memory_space<vmem>>, vector<1x256xf32>
      %130 = vector.shape_cast %129 : vector<1x256xf32> to vector<1x1x256xf32>
      %cst_78 = arith.constant dense<0.000000e+00> : vector<1xf32>
      %131 = vector.multi_reduction <add>, %130, %cst_78 [1, 2] : vector<1x1x256xf32> to vector<1xf32>
      %132 = vector.shape_cast %131 : vector<1xf32> to vector<1x1x1xf32>
      %133 = vector.extract %132[0, 0, 0] : f32 from vector<1x1x1xf32>
      %c1_79 = arith.constant 1 : index
      %c0_80 = arith.constant 0 : index
      %134 = vector.load %arg13[%c1_79, %c0_80] : memref<3x256xf32, #tpu.memory_space<vmem>>, vector<1x256xf32>
      %135 = vector.shape_cast %134 : vector<1x256xf32> to vector<1x1x256xf32>
      %cst_81 = arith.constant dense<0.000000e+00> : vector<1xf32>
      %136 = vector.multi_reduction <add>, %135, %cst_81 [1, 2] : vector<1x1x256xf32> to vector<1xf32>
      %137 = vector.shape_cast %136 : vector<1xf32> to vector<1x1x1xf32>
      %138 = vector.extract %137[0, 0, 0] : f32 from vector<1x1x1xf32>
      %c2_82 = arith.constant 2 : index
      %c0_83 = arith.constant 0 : index
      %139 = vector.load %arg13[%c2_82, %c0_83] : memref<3x256xf32, #tpu.memory_space<vmem>>, vector<1x256xf32>
      %140 = vector.shape_cast %139 : vector<1x256xf32> to vector<1x1x256xf32>
      %cst_84 = arith.constant dense<0.000000e+00> : vector<1xf32>
      %141 = vector.multi_reduction <add>, %140, %cst_84 [1, 2] : vector<1x1x256xf32> to vector<1xf32>
      %142 = vector.shape_cast %141 : vector<1xf32> to vector<1x1x1xf32>
      %143 = vector.extract %142[0, 0, 0] : f32 from vector<1x1x1xf32>
      %144 = tpu.iota {dimensions = array<i32: 1>} : vector<1x128xi32>
      %cst_85 = arith.constant 0.000000e+00 : f32
      %145 = vector.broadcast %cst_85 : f32 to vector<1x128xf32>
      %c0_i32_86 = arith.constant 0 : i32
      %146 = vector.broadcast %c0_i32_86 : i32 to vector<1x128xi32>
      %147 = arith.cmpi eq, %144, %146 : vector<1x128xi32>
      %148 = vector.broadcast %83 : f32 to vector<1x128xf32>
      %149 = arith.select %147, %148, %145 : vector<1x128xi1>, vector<1x128xf32>
      %c1_i32 = arith.constant 1 : i32
      %150 = vector.broadcast %c1_i32 : i32 to vector<1x128xi32>
      %151 = arith.cmpi eq, %144, %150 : vector<1x128xi32>
      %152 = vector.broadcast %88 : f32 to vector<1x128xf32>
      %153 = arith.select %151, %152, %149 : vector<1x128xi1>, vector<1x128xf32>
      %c2_i32 = arith.constant 2 : i32
      %154 = vector.broadcast %c2_i32 : i32 to vector<1x128xi32>
      %155 = arith.cmpi eq, %144, %154 : vector<1x128xi32>
      %156 = vector.broadcast %93 : f32 to vector<1x128xf32>
      %157 = arith.select %155, %156, %153 : vector<1x128xi1>, vector<1x128xf32>
      %c3_i32 = arith.constant 3 : i32
      %158 = vector.broadcast %c3_i32 : i32 to vector<1x128xi32>
      %159 = arith.cmpi eq, %144, %158 : vector<1x128xi32>
      %160 = vector.broadcast %98 : f32 to vector<1x128xf32>
      %161 = arith.select %159, %160, %157 : vector<1x128xi1>, vector<1x128xf32>
      %c4_i32 = arith.constant 4 : i32
      %162 = vector.broadcast %c4_i32 : i32 to vector<1x128xi32>
      %163 = arith.cmpi eq, %144, %162 : vector<1x128xi32>
      %164 = vector.broadcast %103 : f32 to vector<1x128xf32>
      %165 = arith.select %163, %164, %161 : vector<1x128xi1>, vector<1x128xf32>
      %c5_i32 = arith.constant 5 : i32
      %166 = vector.broadcast %c5_i32 : i32 to vector<1x128xi32>
      %167 = arith.cmpi eq, %144, %166 : vector<1x128xi32>
      %168 = vector.broadcast %108 : f32 to vector<1x128xf32>
      %169 = arith.select %167, %168, %165 : vector<1x128xi1>, vector<1x128xf32>
      %c6_i32 = arith.constant 6 : i32
      %170 = vector.broadcast %c6_i32 : i32 to vector<1x128xi32>
      %171 = arith.cmpi eq, %144, %170 : vector<1x128xi32>
      %172 = vector.broadcast %113 : f32 to vector<1x128xf32>
      %173 = arith.select %171, %172, %169 : vector<1x128xi1>, vector<1x128xf32>
      %c7_i32 = arith.constant 7 : i32
      %174 = vector.broadcast %c7_i32 : i32 to vector<1x128xi32>
      %175 = arith.cmpi eq, %144, %174 : vector<1x128xi32>
      %176 = vector.broadcast %118 : f32 to vector<1x128xf32>
      %177 = arith.select %175, %176, %173 : vector<1x128xi1>, vector<1x128xf32>
      %c8_i32 = arith.constant 8 : i32
      %178 = vector.broadcast %c8_i32 : i32 to vector<1x128xi32>
      %179 = arith.cmpi eq, %144, %178 : vector<1x128xi32>
      %180 = vector.broadcast %123 : f32 to vector<1x128xf32>
      %181 = arith.select %179, %180, %177 : vector<1x128xi1>, vector<1x128xf32>
      %c9_i32 = arith.constant 9 : i32
      %182 = vector.broadcast %c9_i32 : i32 to vector<1x128xi32>
      %183 = arith.cmpi eq, %144, %182 : vector<1x128xi32>
      %184 = vector.broadcast %128 : f32 to vector<1x128xf32>
      %185 = arith.select %183, %184, %181 : vector<1x128xi1>, vector<1x128xf32>
      %c10_i32 = arith.constant 10 : i32
      %186 = vector.broadcast %c10_i32 : i32 to vector<1x128xi32>
      %187 = arith.cmpi eq, %144, %186 : vector<1x128xi32>
      %188 = vector.broadcast %133 : f32 to vector<1x128xf32>
      %189 = arith.select %187, %188, %185 : vector<1x128xi1>, vector<1x128xf32>
      %c11_i32 = arith.constant 11 : i32
      %190 = vector.broadcast %c11_i32 : i32 to vector<1x128xi32>
      %191 = arith.cmpi eq, %144, %190 : vector<1x128xi32>
      %192 = vector.broadcast %138 : f32 to vector<1x128xf32>
      %193 = arith.select %191, %192, %189 : vector<1x128xi1>, vector<1x128xf32>
      %c12_i32 = arith.constant 12 : i32
      %194 = vector.broadcast %c12_i32 : i32 to vector<1x128xi32>
      %195 = arith.cmpi eq, %144, %194 : vector<1x128xi32>
      %196 = vector.broadcast %143 : f32 to vector<1x128xf32>
      %197 = arith.select %195, %196, %193 : vector<1x128xi1>, vector<1x128xf32>
      %c0_87 = arith.constant 0 : index
      %c0_88 = arith.constant 0 : index
      %c0_89 = arith.constant 0 : index
      %198 = vector.load %arg6[%c0_87, %c0_88, %c0_89] : memref<1x1x128xf32, #tpu.memory_space<vmem>>, vector<1x1x128xf32>
      %199 = vector.shape_cast %198 : vector<1x1x128xf32> to vector<1x128xf32>
      %200 = vector.shape_cast %197 : vector<1x128xf32> to vector<1x1x128xf32>
      tpu.vector_store %arg6[%c0_87, %c0_88, %c0_89], %200 {strides = array<i32>} : memref<1x1x128xf32, #tpu.memory_space<vmem>>, vector<1x1x128xf32>,
    } else {
    }
    return
  }
  func.func @transform_0(%arg0: i32, %arg1: i32) -> (i32, i32) {
    %c0_i32 = arith.constant 0 : i32
    %c0_i32_0 = arith.constant 0 : i32
    %c0_i32_1 = arith.constant 0 : i32
    return %c0_i32, %c0_i32_0 : i32, i32
  }
  func.func @transform_1(%arg0: i32, %arg1: i32) -> (i32, i32) {
    %c0_i32 = arith.constant 0 : i32
    %c0_i32_0 = arith.constant 0 : i32
    %c0_i32_1 = arith.constant 0 : i32
    return %c0_i32, %c0_i32_0 : i32, i32
  }
  func.func @transform_2(%arg0: i32, %arg1: i32) -> (i32, i32, i32) {
    %c0_i32 = arith.constant 0 : i32
    %c0_i32_0 = arith.constant 0 : i32
    return %arg0, %c0_i32, %arg1 : i32, i32, i32
  }
  func.func @transform_3(%arg0: i32, %arg1: i32) -> (i32, i32, i32) {
    %c0_i32 = arith.constant 0 : i32
    %c0_i32_0 = arith.constant 0 : i32
    return %arg0, %c0_i32, %arg1 : i32, i32, i32
  }
  func.func @transform_4(%arg0: i32, %arg1: i32) -> (i32, i32, i32) {
    %c0_i32 = arith.constant 0 : i32
    %c0_i32_0 = arith.constant 0 : i32
    %c0_i32_1 = arith.constant 0 : i32
    return %arg0, %c0_i32, %c0_i32_0 : i32, i32, i32
  }
}

</mosaic_0001>

<bundles_post_ra>
// kernel: tpu_custom_call.1
= control target key start
LH: loop header
LB: loop body
LE: loop exit
PB: predicated region body
PF: predicated region fallthrough
CT: control target
= control target key end

     0   :  { %9 = vsyncpa [#allocation10], 0  ;;  %s1443_s0 = inlined_call_operand.vmem [shape: f32[3,1], index: 0, kind: input, shape index: {}]   ;;  %s1444_s1 = inlined_call_operand.vmem [shape: f32[3,1], index: 1, kind: input, shape index: {}]   ;;  %s1445_s2 = inlined_call_operand.vmem [shape: s32[2,1,256], index: 2, kind: input, shape index: {}]   ;;  %s1446_s3 = inlined_call_operand.vmem [shape: f32[2,3,256], index: 3, kind: input, shape index: {}]   ;;  %s1447_s4 = inlined_call_operand.hbm [shape: f32[2,1,128], index: 4, kind: output, shape index: {}]  }
   0x1   :  { %11 = vsyncpa [#allocation10 + $0x1], 0  ;;  %s1212_s15 = smov 0   ;;  %s1214_s16 = smov 0  }
   0x2   :  { %s1216_s17 = smov 0   ;;  %s1218_s18 = smov 0  }
   0x3   :  { %s1220_s19 = smov 0   ;;  %s1222_s20 = smov 0  }
   0x4 LB: > { %s991_s21 = sadd.s32 4294967295, %s1181_s20   ;;  %s992_s22 = sadd.s32 4294967294, %s1181_s20   ;;  %s1181_s20 = sphi %s1222_s20, %s17_s20   ;;  %s1177_s19 = sphi %s1220_s19, %s1456_s19   ;;  %s1173_s18 = sphi %s1218_s18, %s1455_s18   ;;  %s1169_s17 = sphi %s1216_s17, %s1454_s17   ;;  %s1165_s16 = sphi %s1214_s16, %s1453_s16   ;;  %s1161_s15 = sphi %s1212_s15, %s1452_s15  }
   0x5   : > { %s29_s23 = sadd.s32 1, %s1177_s19  ;;  %s134_s24 = sadd.s32 1, %s1169_s17 }
   0x6   : > { %p31_p0 = scmp.ge.s32.totalorder %s29_s23, 2  ;;  %p144_p1 = scmp.ne.s32.totalorder %s1169_s17, %s1165_s16 }
   0x7   : > { %p145_p2 = scmp.eq.s32.totalorder %s991_s21, 1  ;;  %p150_p3 = scmp.ne.s32.totalorder %s1165_s16, %s1161_s15 }
   0x8   : > { %s1458_s23 = smov (%p31_p0, %s29_s23), 0  ;;  %p151_p5 = scmp.eq.s32.totalorder %s992_s22, 1 }
   0x9   : > { %p1252_p4 = por %p145_p2, %p144_p1  ;;  %s131_s26 = ssub.s32 %s1177_s19, %s1458_s23 }
   0xa   : > { %p995_p6 = scmp.ge.s32.totalorder %s1181_s20, 1  ;;  %p132_p7 = scmp.eq.s32.totalorder %s131_s26, 0 }
   0xb   : > { %p1259_p8 = por %p151_p5, %p150_p3  ;;  %p200_p9 = scmp.lt.s32.totalorder %s1181_s20, 3 }
   0xc   : > { %s1265_s28 = scalar_select %p132_p7, %s1169_s17, %s134_s24  }
   0xd   : > { %p201_p10 = pnand %p995_p6, %p200_p9 }
   0xe   : > { %v333_v0 = vld [vmem:[%s1443_s0] sm:$0x7] (!%p201_p10)  ;;  %p238_p11 = scmp.lt.s32.totalorder (!%p201_p10), %s1173_s18, 1  ;;  %v260_v1 = vlaneseq (!%p201_p10)  ;;  %v1183_v2 = vmov (!%p201_p10), 0   ;;  %v1184_v4 = vmov (!%p201_p10), 0.0   ;;  %vm318_vm3 = vcmask (!%p201_p10), 1042432  }
   0xf   : > { %204 = sbr.rel (%p201_p10) target bundleno = 443 (0x1bb), region = 36  ;;  %1089 = vset.pattern.permute.xlu0 (!%p201_p10), %v1183_v2  ;;  %268 = vst [vmem:[#allocation6] sm:$0x77] (!%p201_p10), %v1184_v4  ;;  %269 = vst [vmem:[#allocation7] sm:$0x77] (!%p201_p10), %v1184_v4  ;;  %vm547_vm4 = vcmask (!%p201_p10), 1040384  }
  0x10   : > { %336 = vperm.xlu0 (!%p201_p10), %1089, %v333_v0   ;;  %vm1273_vm0 = vcmp.lt.s32.totalorder (!%p201_p10), %v260_v1, 256  ;;  %270 = vst [vmem:[#allocation8] sm:$0x77] (!%p201_p10), %v1184_v4  ;;  %v1278_v5 = vshrl.u32 (!%p201_p10), %v260_v1, 7  ;;  %v355_v6 = vld [vmem:[%s1444_s1] sm:$0x7] (!%p201_p10) }
  0x11   : > { %266 = vst.msk [vmem:[#allocation4] sm:$0x3] (!%p201_p10), %vm1273_vm0, %v1184_v4  ;;  %267 = vst.msk [vmem:[#allocation5] sm:$0x3] (!%p201_p10), %vm1273_vm0, %v1184_v4  ;;  %s235_s10 = sand.u32 (!%p201_p10), 1, %s1165_s16   ;;  %s1001_s13 = sshll.u32 (!%p201_p10), %s1173_s18, 4 }
  0x12   : > { %264 = vst.msk [vmem:[#allocation2] sm:$0x3] (!%p201_p10), %vm1273_vm0, %v1184_v4  ;;  %265 = vst.msk [vmem:[#allocation3] sm:$0x3] (!%p201_p10), %vm1273_vm0, %v1184_v4  ;;  %v1292_v7 = vsub.s32 (!%p201_p10), 0, %v1278_v5  ;;  %v1295_v8 = vsub.s32 (!%p201_p10), 1, %v1278_v5 }
  0x13   : > { %s236_s14 = scalar_lea.vmem (!%p201_p10), [#allocation9], %s235_s10 }
  0x14   : > { %358 = vperm.xlu0 (!%p201_p10), %1089, %v355_v6  }
  0x16   : > { %s239_s5 = scalar_select %p238_p11, %s1173_s18, 1  ;;  %v509_v37 = vld [vmem:[#allocation6] sm:$0x77]  ;;  %v516_v47 = vld [vmem:[#allocation7] sm:$0x77] }
  0x17   : > { %v525_v42 = vld [vmem:[#allocation8] sm:$0x77] }
  0x18   : > { %s996_s8 = sshll.u32 %s239_s5, 1  ;;  %s1004_s9 = sshll.u32 %s239_s5, 3 }
  0x19   : > { %s244_s12 = scalar_lea.vmem %s1445_s2, %s996_s8  ;;  %s254_s21 = scalar_lea.vmem %s1446_s3, %s1004_s9 }
  0x1a   : > { %v271_v9 = vld [vmem:[%s254_s21] sm:$0x77]  ;;  %s907_s21 = sshll.u32 %s236_s14, 4  ;;  %s1398_s21 = int_to_ptr.vmem [resolvable:$true] %s907_s21 }
  0x1b   : > { %v272_v10 = vld [vmem:[%s244_s12] sm:$0x3]  ;;  %v286_v11 = vcombine.high %v271_v9, %v271_v9  ;;  %v441_v14 = vmul.f32 1.442695, %v271_v9  ;;  %v517_v39 = vmul.f32 %v271_v9, %v271_v9  ;;  %s1103_s18 = scalar_lea.vmem %s1398_s21, 16 }
  0x1c   : > { %v293_v12 = vrot.slane %v272_v10, %v1292_v7  ;;  %v297_v13 = vrot.slane %v272_v10, %v1295_v8  ;;  %p1104_p12 = scmp.ne.s32.totalorder %s1398_s21, %s1103_s18 }
  0x1d   : > { %1091 = vpow2.f32 %v441_v14  ;;  %v443_v17 = vmul.f32 1.442695, %v286_v11  ;;  %v518_v41 = vmul.f32 %v286_v11, %v286_v11 }
  0x1e   : > { %v305_v15 = vrot.slane %v293_v12, %v1292_v7  ;;  %v309_v16 = vrot.slane %v297_v13, %v1292_v7  ;;  %p1105_p13 = pnand %p1104_p12, %p1252_p4 }
  0x1f   : > { %1093 = vpow2.f32 %v443_v17  ;;  %v521_v49 = vcombine.low %v517_v39, %v518_v41 }
  0x20   : > { %vm310_vm1 = vcmp.eq.s32.totalorder %v305_v15, %v1278_v5  ;;  %vm311_vm2 = vcmp.eq.s32.totalorder %v309_v16, %v1278_v5  ;;  %v1185_v15 = vmov 1966171168   ;;  %p1106_p0 = pneg %p1105_p13 }
  0x21   : > { %v1309_v18 = vsel %vm310_vm1, 1.0, %v1184_v4  ;;  %v1311_v19 = vsel %vm311_vm2, 1.0, %v1184_v4  ;;  %v523_v54 = vadd.f32 %v521_v49, %v516_v47  ;;  %v398_v16 = vunpack.c.l.s4 %v1185_v15 }
  0x22   : > { %v316_v20 = vmul.f32 %v1309_v18, %v271_v9  ;;  %v317_v22 = vmul.f32 %v1311_v19, %v286_v11  ;;  %v528_v43 = vcombine.low %v1309_v18, %v1311_v19 }
  0x23   : > { %524 = vst [vmem:[#allocation7] sm:$0x77] %v523_v54 }
  0x24   : > { %v319_v25 = vsel %vm318_vm3, %v316_v20, 0.0  ;;  %v326_v28 = vsel %vm318_vm3, %v317_v22, 0.0  ;;  %v512_v38 = vcombine.low %v316_v20, %v317_v22  ;;  %v530_v50 = vadd.f32 %v528_v43, %v525_v42 }
  0x25   : > { %v320_v31 = vrot.slane %v319_v25, 4  ;;  %v327_v34 = vrot.slane %v326_v28, 4 }
  0x26   : > { %v514_v46 = vadd.f32 %v512_v38, %v509_v37  ;;  %531 = vst [vmem:[#allocation8] sm:$0x77] %v530_v50 }
  0x27   : > { %v1092_v21 = vpop.eup %1091  ;;  %v321_v40 = vadd.f32 %v320_v31, %v319_v25  ;;  %v328_v48 = vadd.f32 %v327_v34, %v326_v28 }
  0x28   : > { %v445_v23 = vsel %vm318_vm3, %v1092_v21, 0.0  ;;  %515 = vst [vmem:[#allocation6] sm:$0x77] %v514_v46 }
  0x29   : > { %v1094_v24 = vpop.eup %1093  ;;  %v446_v26 = vrot.slane %v445_v23, 4  ;;  %v322_v53 = vrot.slane %v321_v40, 2  ;;  %v329_v56 = vrot.slane %v328_v48, 2 }
  0x2a   : > { %v452_v27 = vsel %vm318_vm3, %v1094_v24, 0.0 }
  0x2b   : > { %v447_v29 = vadd.f32 %v446_v26, %v445_v23  ;;  %v453_v30 = vrot.slane %v452_v27, 4  ;;  %v323_v57 = vadd.f32 %v322_v53, %v321_v40  ;;  %v330_v58 = vadd.f32 %v329_v56, %v328_v48 }
  0x2d   : > { %v448_v32 = vrot.slane %v447_v29, 2  ;;  %v454_v33 = vadd.f32 %v453_v30, %v452_v27  ;;  %v324_v59 = vrot.slane %v323_v57, 1  ;;  %v331_v60 = vrot.slane %v330_v58, 1 }
  0x2f   : > { %v449_v35 = vadd.f32 %v448_v32, %v447_v29  ;;  %v455_v36 = vrot.slane %v454_v33, 2  ;;  %v325_v62 = vadd.f32 %v324_v59, %v323_v57  ;;  %v332_v2 = vadd.f32 %v331_v60, %v330_v58 }
  0x30   : > { %v399_v32 = vunpack.c.0.s8 %v398_v16 }
  0x31   : > { %v450_v44 = vrot.slane %v449_v35, 1  ;;  %v456_v45 = vadd.f32 %v455_v36, %v454_v33  ;;  %v385_v24 = vsub.f32 1.0, %v325_v62  ;;  %v386_v25 = vsub.f32 1.0, %v332_v2 }
  0x32   : > { %v402_v49 = vsub.s32 %v399_v32, %v1278_v5 }
  0x33   : > { %v451_v51 = vadd.f32 %v450_v44, %v449_v35  ;;  %v457_v52 = vrot.slane %v456_v45, 1  ;;  %v387_v41 = vmul.f32 %v385_v24, %v385_v24  ;;  %v388_v42 = vmul.f32 %v386_v25, %v386_v25  ;;  %v418_v25 = vld [vmem:[#allocation3] sm:$0x3] }
  0x35   : > { %v458_v55 = vadd.f32 %v457_v52, %v456_v45  ;;  %1095 = vlog2.f32 %v451_v51 }
  0x37   : > { %1097 = vlog2.f32 %v458_v55 }
  0x38   : > { %1099 = vlog2.f32 %v325_v62 }
  0x39   : > { %1101 = vlog2.f32 %v332_v2 }
  0x3f   : > { %v1096_v61 = vpop.eup %1095 }
  0x40   : > { %v460_v63 = vmul.f32 0.6931472, %v1096_v61 }
  0x41   : > { %v1098_v0 = vpop.eup %1097 }
  0x42   : > { %v462_v4 = vmul.f32 0.6931472, %v1098_v0  ;;  %v464_v6 = vsub.f32 %v460_v63, %v325_v62  ;;  %v1100_v11 = vpop.eup %1099 }
  0x43   : > { %v1102_v14 = vpop.eup %1101  ;;  %v380_v28 = vmul.f32 0.6931472, %v1100_v11 }
  0x44   : > { %v465_v9 = vsub.f32 %v462_v4, %v332_v2  ;;  %v382_v29 = vmul.f32 0.6931472, %v1102_v14  ;;  %v488_v4 = vld [vmem:[#allocation5] sm:$0x3]  ;;  %v463_v14 = vld [vmem:[#allocation4] sm:$0x3] }
  0x45   : > { %v383_v39 = vsub.f32 0.0, %v380_v28 }
  0x46   : > { %v384_v40 = vsub.f32 0.0, %v382_v29 }
  0x47   : > { %v389_v50 = vmul.f32 %v387_v41, %v383_v39 }
  0x48   : > { %v390_v51 = vmul.f32 %v388_v42, %v384_v40 }
  0x8f   : > { %v337_v10 = vpop.permute.xlu0 %336 }
  0x90   : > { %v339_v12 = vmul.f32 %v1309_v18, %v337_v10  ;;  %v340_v13 = vmul.f32 %v1311_v19, %v337_v10 }
  0x92   : > { %v341_v17 = vsel %vm318_vm3, %v339_v12, 0.0  ;;  %v348_v20 = vsel %vm318_vm3, %v340_v13, 0.0 }
  0x93   : > { %v342_v21 = vrot.slane %v341_v17, 4  ;;  %v349_v22 = vrot.slane %v348_v20, 4  ;;  %v359_v23 = vpop.permute.xlu0 %358 }
  0x94   : > { %v361_v26 = vmul.f32 %v1309_v18, %v359_v23  ;;  %v362_v27 = vmul.f32 %v1311_v19, %v359_v23 }
  0x95   : > { %v343_v30 = vadd.f32 %v342_v21, %v341_v17  ;;  %v350_v31 = vadd.f32 %v349_v22, %v348_v20 }
  0x96   : > { %v363_v33 = vsel %vm318_vm3, %v361_v26, 0.0  ;;  %v370_v34 = vsel %vm318_vm3, %v362_v27, 0.0  ;;  %v805_v27 = vld [vmem:[#allocation8 + $0x1] ss:$4 sm:$0x3] }
  0x97   : > { %v344_v35 = vrot.slane %v343_v30, 2  ;;  %v351_v36 = vrot.slane %v350_v31, 2  ;;  %v364_v37 = vrot.slane %v363_v33, 4  ;;  %v371_v38 = vrot.slane %v370_v34, 4 }
  0x98   : > { %v810_v29 = vrot.slane %v805_v27, %v1292_v7 }
  0x99   : > { %v345_v18 = vadd.f32 %v344_v35, %v343_v30  ;;  %v352_v43 = vadd.f32 %v351_v36, %v350_v31  ;;  %v365_v19 = vadd.f32 %v364_v37, %v363_v33  ;;  %v372_v44 = vadd.f32 %v371_v38, %v370_v34 }
  0x9a   : > { %v814_v30 = vrot.slane %v805_v27, %v1295_v8  ;;  %v817_v37 = vsel %vm547_vm4, %v810_v29, 0.0  ;;  %v780_v29 = vld [vmem:[#allocation8] ss:$4 sm:$0x3] }
  0x9b   : > { %v346_v45 = vrot.slane %v345_v18, 1  ;;  %v353_v46 = vrot.slane %v352_v43, 1  ;;  %v366_v47 = vrot.slane %v365_v19, 2  ;;  %v373_v48 = vrot.slane %v372_v44, 2 }
  0x9c   : > { %v818_v3 = vsel %vm547_vm4, %v814_v30, 0.0 }
  0x9d   : > { %v347_v52 = vadd.f32 %v346_v45, %v345_v18  ;;  %v354_v53 = vadd.f32 %v353_v46, %v352_v43  ;;  %v367_v54 = vadd.f32 %v366_v47, %v365_v19  ;;  %v374_v55 = vadd.f32 %v373_v48, %v372_v44  ;;  %v632_v44 = vld [vmem:[#allocation6] ss:$4 sm:$0x3] }
  0x9e   : > { %v819_v45 = vadd.f32 %v818_v3, %v817_v37 }
  0x9f   : > { %v466_v56 = vmul.f32 %v464_v6, %v347_v52  ;;  %v467_v57 = vmul.f32 %v465_v9, %v354_v53  ;;  %v491_v58 = vcombine.low %v347_v52, %v354_v53  ;;  %v368_v59 = vrot.slane %v367_v54, 1  ;;  %v391_v9 = vld [vmem:[#allocation2] sm:$0x3] }
  0xa0   : > { %v375_v60 = vrot.slane %v374_v55, 1  ;;  %v392_v61 = vmul.f32 %v389_v50, %v347_v52  ;;  %v393_v62 = vmul.f32 %v390_v51, %v354_v53  ;;  %v637_v52 = vrot.slane %v632_v44, %v1292_v7 }
  0xa1   : > { %v470_v63 = vcombine.low %v466_v56, %v467_v57  ;;  %v498_v0 = vrot.slane %v491_v58, %v402_v49  ;;  %v369_v2 = vadd.f32 %v368_v59, %v367_v54  ;;  %v641_v53 = vrot.slane %v632_v44, %v1295_v8 }
  0xa2   : > { %v376_v10 = vadd.f32 %v375_v60, %v374_v55  ;;  %v396_v11 = vcombine.low %v392_v61, %v393_v62  ;;  %v657_v55 = vld [vmem:[#allocation6 + $0x1] ss:$4 sm:$0x3]  ;;  %v644_v58 = vsel %vm547_vm4, %v637_v52, 0.0 }
  0xa3   : > { %v477_v5 = vrot.slane %v470_v63, %v402_v49  ;;  %v505_v12 = vrot.slane %v498_v0, %v402_v49  ;;  %v419_v13 = vmul.f32 %v389_v50, %v369_v2  ;;  %v645_v59 = vsel %vm547_vm4, %v641_v53, 0.0  ;;  %v682_v63 = vld [vmem:[#allocation6 + $0x2] ss:$4 sm:$0x3] }
  0xa4   : > { %v403_v15 = vrot.slane %v396_v11, %v402_v49  ;;  %v420_v16 = vmul.f32 %v390_v51, %v376_v10  ;;  %v662_v60 = vrot.slane %v657_v55, %v1292_v7  ;;  %v666_v61 = vrot.slane %v657_v55, %v1295_v8 }
  0xa5   : > { %v484_v17 = vrot.slane %v477_v5, %v402_v49  ;;  %v507_v6 = vadd.f32 %v505_v12, %v488_v4  ;;  %v646_v0 = vadd.f32 %v645_v59, %v644_v58  ;;  %v687_v10 = vrot.slane %v682_v63, %v1292_v7  ;;  %v706_v5 = vld [vmem:[#allocation7] ss:$4 sm:$0x3] }
  0xa6   : > { %v410_v20 = vrot.slane %v403_v15, %v402_v49  ;;  %v423_v21 = vcombine.low %v419_v13, %v420_v16  ;;  %v669_v2 = vsel %vm547_vm4, %v662_v60, 0.0  ;;  %v670_v4 = vsel %vm547_vm4, %v666_v61, 0.0 }
  0xa7   : > { %v486_v22 = vadd.f32 %v484_v17, %v463_v14  ;;  %508 = vst.msk [vmem:[#allocation5] sm:$0x3] %vm1273_vm0, %v507_v6  ;;  %v691_v11 = vrot.slane %v682_v63, %v1295_v8  ;;  %v671_v12 = vadd.f32 %v670_v4, %v669_v2  ;;  %v694_v13 = vsel %vm547_vm4, %v687_v10, 0.0  ;;  %v731_v17 = vld [vmem:[#allocation7 + $0x1] ss:$4 sm:$0x3] }
  0xa8   : > { %v412_v23 = vadd.f32 %v410_v20, %v391_v9  ;;  %v430_v24 = vrot.slane %v423_v21, %v402_v49  ;;  %v711_v15 = vrot.slane %v706_v5, %v1292_v7  ;;  %v715_v16 = vrot.slane %v706_v5, %v1295_v8 }
  0xa9   : > { %487 = vst.msk [vmem:[#allocation4] sm:$0x3] %vm1273_vm0, %v486_v22  ;;  %v695_v14 = vsel %vm547_vm4, %v691_v11, 0.0  ;;  %v736_v21 = vrot.slane %v731_v17, %v1292_v7  ;;  %v740_v22 = vrot.slane %v731_v17, %v1295_v8 }
  0xaa   : > { %417 = vst.msk [vmem:[#allocation2] sm:$0x3] %vm1273_vm0, %v412_v23  ;;  %v437_v26 = vrot.slane %v430_v24, %v402_v49  ;;  %v696_v6 = vadd.f32 %v695_v14, %v694_v13  ;;  %v718_v9 = vsel %vm547_vm4, %v711_v15, 0.0  ;;  %v719_v20 = vsel %vm547_vm4, %v715_v16, 0.0 }
  0xab   : > { %v756_v23 = vld [vmem:[#allocation7 + $0x2] ss:$4 sm:$0x3]  ;;  %v720_v24 = vadd.f32 %v719_v20, %v718_v9 }
  0xac   : > { %v439_v28 = vadd.f32 %v437_v26, %v418_v25  ;;  %v743_v25 = vsel %vm547_vm4, %v736_v21, 0.0  ;;  %v744_v26 = vsel %vm547_vm4, %v740_v22, 0.0  ;;  %v761_v27 = vrot.slane %v756_v23, %v1292_v7 }
  0xad   : > { %v745_v30 = vadd.f32 %v744_v26, %v743_v25 }
  0xae   : > { %440 = vst.msk [vmem:[#allocation3] sm:$0x3] %vm1273_vm0, %v439_v28  ;;  %v608_v40 = vld [vmem:[#allocation5] sm:$0x3]  ;;  %v765_v28 = vrot.slane %v756_v23, %v1295_v8 }
  0xaf   : > { %v613_v48 = vrot.slane %v608_v40, %v1292_v7  ;;  %v617_v49 = vrot.slane %v608_v40, %v1295_v8 }
  0xb0   : > { %v584_v31 = vld [vmem:[#allocation4] sm:$0x3] }
  0xb1   : > { %v589_v32 = vrot.slane %v584_v31, %v1292_v7  ;;  %v593_v33 = vrot.slane %v584_v31, %v1295_v8  ;;  %v535_v34 = vld [vmem:[#allocation2] sm:$0x3]  ;;  %v620_v56 = vsel %vm547_vm4, %v613_v48, 0.0  ;;  %v621_v57 = vsel %vm547_vm4, %v617_v49, 0.0 }
  0xb2   : > { %v540_v35 = vrot.slane %v535_v34, %v1292_v7  ;;  %v544_v36 = vrot.slane %v535_v34, %v1295_v8  ;;  %v622_v62 = vadd.f32 %v621_v57, %v620_v56  ;;  %v768_v31 = vsel %vm547_vm4, %v761_v27, 0.0 }
  0xb3   : > { %v596_v38 = vsel %vm547_vm4, %v589_v32, 0.0  ;;  %v597_v39 = vsel %vm547_vm4, %v593_v33, 0.0  ;;  %v769_v32 = vsel %vm547_vm4, %v765_v28, 0.0  ;;  %v785_v33 = vrot.slane %v780_v29, %v1292_v7 }
  0xb4   : > { %v598_v41 = vadd.f32 %v597_v39, %v596_v38  ;;  %v548_v42 = vsel %vm547_vm4, %v540_v35, 0.0  ;;  %v549_v18 = vsel %vm547_vm4, %v544_v36, 0.0  ;;  %v789_v34 = vrot.slane %v780_v29, %v1295_v8  ;;  %v830_v35 = vld [vmem:[#allocation8 + $0x2] ss:$4 sm:$0x3] }
  0xb5   : > { %v550_v43 = vadd.f32 %v549_v18, %v548_v42  ;;  %v560_v19 = vld [vmem:[#allocation3] sm:$0x3]  ;;  %v770_v36 = vadd.f32 %v769_v32, %v768_v31  ;;  %v792_v37 = vsel %vm547_vm4, %v785_v33, 0.0  ;;  %v835_v38 = vrot.slane %v830_v35, %v1292_v7 }
  0xb6   : > { %599 = vadd.xlane.f32.xlu0 %v598_v41  ;;  %v565_v46 = vrot.slane %v560_v19, %v1292_v7  ;;  %v569_v47 = vrot.slane %v560_v19, %v1295_v8  ;;  %v793_v3 = vsel %vm547_vm4, %v789_v34, 0.0  ;;  %v839_v39 = vrot.slane %v830_v35, %v1295_v8 }
  0xb7   : > { %551 = vadd.xlane.f32.xlu1 %v550_v43  ;;  %v794_v40 = vadd.f32 %v793_v3, %v792_v37  ;;  %v842_v41 = vsel %vm547_vm4, %v835_v38, 0.0 }
  0xb8   : > { %v572_v50 = vsel %vm547_vm4, %v565_v46, 0.0  ;;  %v573_v51 = vsel %vm547_vm4, %v569_v47, 0.0  ;;  %v843_v42 = vsel %vm547_vm4, %v839_v39, 0.0 }
  0xb9   : > { %v574_v54 = vadd.f32 %v573_v51, %v572_v50  ;;  %v844_v18 = vadd.f32 %v843_v42, %v842_v41 }
  0xba   : > { %820 = vadd.xlane.f32.xlu0 %v819_v45 }
  0xbb   : > { %575 = vadd.xlane.f32.xlu1 %v574_v54 }
  0xbf   : > { %623 = vadd.xlane.f32.xlu1 %v622_v62 }
  0xc3   : > { %647 = vadd.xlane.f32.xlu1 %v646_v0 }
  0xc7   : > { %672 = vadd.xlane.f32.xlu1 %v671_v12 }
  0xcb   : > { %697 = vadd.xlane.f32.xlu1 %v696_v6 }
  0xcf   : > { %721 = vadd.xlane.f32.xlu1 %v720_v24 }
  0xd3   : > { %746 = vadd.xlane.f32.xlu1 %v745_v30 }
  0xd7   : > { %771 = vadd.xlane.f32.xlu1 %v770_v36 }
  0xdb   : > { %795 = vadd.xlane.f32.xlu1 %v794_v40 }
  0xdf   : > { %845 = vadd.xlane.f32.xlu1 %v844_v18 }
 0x143   : > { %v600_v43 = vpop.xlane.xlu0 %599 }
 0x144   : > { %v601_v19 = vrot.slane %v600_v43, 4  ;;  %v552_v44 = vpop.xlane.xlu1 %551 }
 0x145   : > { %v553_v45 = vrot.slane %v552_v44, 4 }
 0x146   : > { %v602_v46 = vadd.f32 %v601_v19, %v600_v43 }
 0x147   : > { %v554_v47 = vadd.f32 %v553_v45, %v552_v44  ;;  %v821_v29 = vpop.xlane.xlu0 %820 }
 0x148   : > { %v603_v48 = vrot.slane %v602_v46, 2  ;;  %v576_v49 = vpop.xlane.xlu1 %575  ;;  %v822_v34 = vrot.slane %v821_v29, 4 }
 0x149   : > { %v555_v7 = vrot.slane %v554_v47, 2  ;;  %v577_v50 = vrot.slane %v576_v49, 4 }
 0x14a   : > { %v604_v53 = vadd.f32 %v603_v48, %v602_v46  ;;  %v823_v41 = vadd.f32 %v822_v34, %v821_v29 }
 0x14b   : > { %v578_v8 = vadd.f32 %v577_v50, %v576_v49  ;;  %v556_v51 = vadd.f32 %v555_v7, %v554_v47 }
 0x14c   : > { %v624_v52 = vpop.xlane.xlu1 %623  ;;  %v605_v61 = vrot.slane %v604_v53, 1  ;;  %v824_v46 = vrot.slane %v823_v41, 2 }
 0x14d   : > { %v579_v54 = vrot.slane %v578_v8, 2  ;;  %v625_v55 = vrot.slane %v624_v52, 4  ;;  %v557_v56 = vrot.slane %v556_v51, 1 }
 0x14e   : > { %v606_v5 = vadd.f32 %v605_v61, %v604_v53 }
 0x14f   : > { %v626_v57 = vadd.f32 %v625_v55, %v624_v52  ;;  %v558_v58 = vadd.f32 %v557_v56, %v556_v51  ;;  %v580_v59 = vadd.f32 %v579_v54, %v578_v8  ;;  %v825_v52 = vadd.f32 %v824_v46, %v823_v41 }
 0x150   : > { %v648_v60 = vpop.xlane.xlu1 %647 }
 0x151   : > { %v627_v62 = vrot.slane %v626_v57, 2  ;;  %v649_v63 = vrot.slane %v648_v60, 4  ;;  %1005 = vpush %v558_v58  ;;  %v581_v0 = vrot.slane %v580_v59, 1 }
 0x153   : > { %v650_v2 = vadd.f32 %v649_v63, %v648_v60  ;;  %v582_v4 = vadd.f32 %v581_v0, %v580_v59  ;;  %v628_v10 = vadd.f32 %v627_v62, %v626_v57  ;;  %v826_v60 = vrot.slane %v825_v52, 1 }
 0x154   : > { %v673_v11 = vpop.xlane.xlu1 %672 }
 0x155   : > { %v651_v12 = vrot.slane %v650_v2, 2  ;;  %v674_v13 = vrot.slane %v673_v11, 4  ;;  %1007 = vpush %v582_v4  ;;  %v629_v14 = vrot.slane %v628_v10, 1 }
 0x156   : > { %1009 = vpush %v606_v5 }
 0x157   : > { %v675_v15 = vadd.f32 %v674_v13, %v673_v11  ;;  %v630_v16 = vadd.f32 %v629_v14, %v628_v10  ;;  %v652_v17 = vadd.f32 %v651_v12, %v650_v2  ;;  %v827_v2 = vadd.f32 %v826_v60, %v825_v52 }
 0x158   : > { %v698_v6 = vpop.xlane.xlu1 %697  ;;  %v274_v11 = vand.u32 127, %v260_v1 }
 0x159   : > { %v676_v9 = vrot.slane %v675_v15, 2  ;;  %v699_v20 = vrot.slane %v698_v6, 4  ;;  %1011 = vpush %v630_v16  ;;  %v653_v21 = vrot.slane %v652_v17, 1 }
 0x15a   : > { %vm854_vm5 = vcmp.eq.s32.totalorder %v274_v11, 0  ;;  %vm857_vm6 = vcmp.eq.s32.totalorder %v274_v11, 1  ;;  %vm860_vm7 = vcmp.eq.s32.totalorder %v274_v11, 2  ;;  %vm863_vm8 = vcmp.eq.s32.totalorder %v274_v11, 3 }
 0x15b   : > { %v700_v22 = vadd.f32 %v699_v20, %v698_v6  ;;  %v654_v23 = vadd.f32 %v653_v21, %v652_v17  ;;  %v677_v24 = vadd.f32 %v676_v9, %v675_v15  ;;  %vm866_vm9 = vcmp.eq.s32.totalorder %v274_v11, 4 }
 0x15c   : > { %v722_v25 = vpop.xlane.xlu1 %721  ;;  %vm869_vm10 = vcmp.eq.s32.totalorder %v274_v11, 5  ;;  %vm872_vm11 = vcmp.eq.s32.totalorder %v274_v11, 6  ;;  %vm875_vm12 = vcmp.eq.s32.totalorder %v274_v11, 7  ;;  %vm878_vm13 = vcmp.eq.s32.totalorder %v274_v11, 8 }
 0x15d   : > { %v701_v26 = vrot.slane %v700_v22, 2  ;;  %v723_v27 = vrot.slane %v722_v25, 4  ;;  %1013 = vpush %v654_v23  ;;  %v678_v28 = vrot.slane %v677_v24, 1  ;;  %vm881_vm14 = vcmp.eq.s32.totalorder %v274_v11, 9 }
 0x15e   : > { %vm884_vm15 = vcmp.eq.s32.totalorder %v274_v11, 10  ;;  %vm887_vm0 = vcmp.eq.s32.totalorder %v274_v11, 11  ;;  %vm890_vm1 = vcmp.eq.s32.totalorder %v274_v11, 12 }
 0x15f   : > { %v724_v30 = vadd.f32 %v723_v27, %v722_v25  ;;  %v679_v31 = vadd.f32 %v678_v28, %v677_v24  ;;  %v702_v32 = vadd.f32 %v701_v26, %v700_v22 }
 0x160   : > { %v747_v33 = vpop.xlane.xlu1 %746 }
 0x161   : > { %v725_v35 = vrot.slane %v724_v30, 2  ;;  %v748_v36 = vrot.slane %v747_v33, 4  ;;  %1015 = vpush %v679_v31  ;;  %v703_v37 = vrot.slane %v702_v32, 1 }
 0x163   : > { %v749_v3 = vadd.f32 %v748_v36, %v747_v33  ;;  %v704_v38 = vadd.f32 %v703_v37, %v702_v32  ;;  %v726_v39 = vadd.f32 %v725_v35, %v724_v30 }
 0x164   : > { %v772_v40 = vpop.xlane.xlu1 %771 }
 0x165   : > { %v750_v42 = vrot.slane %v749_v3, 2  ;;  %v773_v18 = vrot.slane %v772_v40, 4  ;;  %1017 = vpush %v704_v38  ;;  %v727_v43 = vrot.slane %v726_v39, 1 }
 0x167   : > { %v774_v19 = vadd.f32 %v773_v18, %v772_v40  ;;  %v728_v44 = vadd.f32 %v727_v43, %v726_v39  ;;  %v751_v45 = vadd.f32 %v750_v42, %v749_v3 }
 0x168   : > { %v796_v47 = vpop.xlane.xlu1 %795 }
 0x169   : > { %v775_v48 = vrot.slane %v774_v19, 2  ;;  %v797_v49 = vrot.slane %v796_v47, 4  ;;  %1019 = vpush %v728_v44  ;;  %v752_v7 = vrot.slane %v751_v45, 1 }
 0x16b   : > { %v798_v50 = vadd.f32 %v797_v49, %v796_v47  ;;  %v753_v8 = vadd.f32 %v752_v7, %v751_v45  ;;  %v776_v51 = vadd.f32 %v775_v48, %v774_v19 }
 0x16c   : > { %v846_v53 = vpop.xlane.xlu1 %845 }
 0x16d   : > { %v799_v54 = vrot.slane %v798_v50, 2  ;;  %v847_v55 = vrot.slane %v846_v53, 4  ;;  %1021 = vpush %v753_v8  ;;  %v777_v56 = vrot.slane %v776_v51, 1 }
 0x16f   : > { %v848_v57 = vadd.f32 %v847_v55, %v846_v53  ;;  %v778_v58 = vadd.f32 %v777_v56, %v776_v51  ;;  %v800_v59 = vadd.f32 %v799_v54, %v798_v50 }
 0x171   : > { %v849_v61 = vrot.slane %v848_v57, 2  ;;  %1023 = vpush %v778_v58  ;;  %v801_v62 = vrot.slane %v800_v59, 1 }
 0x173   : > { %v850_v63 = vadd.f32 %v849_v61, %v848_v57  ;;  %v802_v0 = vadd.f32 %v801_v62, %v800_v59 }
 0x175   : > { %1025 = vpush %v802_v0  ;;  %v851_v4 = vrot.slane %v850_v63, 1 }
 0x176   : > { %1027 = vpush %v827_v2 }
 0x177   : > { %v852_v10 = vadd.f32 %v851_v4, %v850_v63 }
 0x179   : > { %1029 = vpush %v852_v10 }
 0x182   : > { %s1006_s22 = spop %1005 }
 0x183   : > { %v855_v5 = vstv %s1006_s22 }
 0x184   : > { %v856_v13 = vsel %vm854_vm5, %v855_v5, 0.0 }
 0x186   : > { %s1008_s24 = spop %1007 }
 0x187   : > { %v858_v12 = vstv %s1008_s24  ;;  %s1010_s26 = spop %1009 }
 0x188   : > { %v859_v14 = vsel %vm857_vm6, %v858_v12, %v856_v13  ;;  %v861_v15 = vstv %s1010_s26 }
 0x189   : > { %v862_v17 = vsel %vm860_vm7, %v861_v15, %v859_v14 }
 0x18a   : > { %s1012_s29 = spop %1011 }
 0x18b   : > { %v864_v16 = vstv %s1012_s29  ;;  %s1396_s29 = scalar_lea.hbm %s1447_s4, %s1001_s13 }
 0x18c   : > { %v865_v9 = vsel %vm863_vm8, %v864_v16, %v862_v17 }
 0x18e   : > { %s1014_s30 = spop %1013 }
 0x18f   : > { %v867_v1 = vstv %s1014_s30  ;;  %s895_s30 = scalar_lea.sflag [#allocation10], %s235_s10 }
 0x190   : > { %v868_v21 = vsel %vm866_vm9, %v867_v1, %v865_v9 }
 0x192   : > { %s1016_s5 = spop %1015 }
 0x193   : > { %v870_v6 = vstv %s1016_s5  ;;  %s1186_s5 = smov [#allocation9]  }
 0x194   : > { %v871_v23 = vsel %vm869_vm10, %v870_v6, %v868_v21 }
 0x196   : > { %s1018_s6 = spop %1017 }
 0x197   : > { %v873_v20 = vstv %s1018_s6  ;;  %s1107_s6 = sshll.u32 %s1186_s5, 4  ;;  %s1108_s6 = int_to_ptr.vmem [resolvable:$false] %s1107_s6 }
 0x198   : > { %v874_v25 = vsel %vm872_vm11, %v873_v20, %v871_v23  ;;  %p1110_p1 = scmp.lt.s32.totalorder %s1398_s21, %s1108_s6 }
 0x19a   : > { %s1020_s7 = spop %1019 }
 0x19b   : > { %v876_v22 = vstv %s1020_s7  ;;  %s1109_s7 = scalar_lea.vmem %s1108_s6, 32 }
 0x19c   : > { %v877_v27 = vsel %vm875_vm12, %v876_v22, %v874_v25  ;;  %p1111_p2 = scmp.lt.s32.totalorder %s1109_s7, %s1103_s18 }
 0x19e   : > { %s1022_s8 = spop %1021  ;;  %p1112_p3 = por %p1111_p2, %p1110_p1 }
 0x19f   : > { %v879_v24 = vstv %s1022_s8 }
 0x1a0   : > { %v880_v28 = vsel %vm878_vm13, %v879_v24, %v877_v27  ;;  %p1113_p5 = pnand %p1112_p3, %p1106_p0 }
 0x1a2   : > { %s1024_s9 = spop %1023 }
 0x1a3   : > { %v882_v26 = vstv %s1024_s9 }
 0x1a4   : > { %v883_v29 = vsel %vm881_vm14, %v882_v26, %v880_v28 }
 0x1a6   : > { %s1026_s11 = spop %1025 }
 0x1a7   : > { %v885_v30 = vstv %s1026_s11  ;;  %s1028_s12 = spop %1027 }
 0x1a8   : > { %v886_v31 = vsel %vm884_vm15, %v885_v30, %v883_v29  ;;  %v888_v32 = vstv %s1028_s12 }
 0x1a9   : > { %v889_v33 = vsel %vm887_vm0, %v888_v32, %v886_v31 }
 0x1aa   : > { %s1030_s22 = spop %1029 }
 0x1ab   : > { %v891_v34 = vstv %s1030_s22 }
 0x1ac   : > { %v892_v35 = vsel %vm890_vm1, %v891_v34, %v889_v33 }
 0x1ad   : > { %893 = vst [vmem:[%s236_s14] sm:$0x1] %v892_v35 }
 0x1ae   : > { %1116 = shalt.err (!%p1113_p5)
}
 0x1af   : > { %s1117_s8 = scalar_lea.hbm %s1396_s29, 16  ;;  %s1121_s11 = scalar_lea.hbm %s1447_s4, 32 }
 0x1b0   : > { %p1118_p6 = scmp.ne.s32.totalorder %s1396_s29, %s1117_s8  ;;  %p1122_p10 = scmp.lt.u32.totalorder %s1396_s29, %s1447_s4 }
 0x1b1   : > { %p1123_p11 = scmp.lt.u32.totalorder %s1121_s11, %s1117_s8  ;;  %p1125_p13 = scmp.lt.u32.totalorder %s1117_s8, %s1396_s29 }
 0x1b2   : > { %p1119_p7 = pnand %p1118_p6, %p1252_p4 }
 0x1b3   : > { %p1124_p12 = por %p1123_p11, %p1122_p10 }
 0x1b4   : > { %p1120_p9 = pneg %p1119_p7 }
 0x1b5   : > { %p1126_p0 = por %p1125_p13, %p1124_p12 }
 0x1b7   : > { %p1127_p1 = pnand %p1126_p0, %p1120_p9 }
 0x1b9   : > { %1130 = shalt.err (!%p1127_p1)
}
 0x1ba   : > { %1031 = dma.vmem_to_hbm [thread:$0]  (%p1252_p4), %s1398_s21, 16, %s1396_s29, %s895_s30  }
 0x1bb PF: > { %p1037_p2 = scmp.ge.s32.totalorder %s1181_s20, 2  ;;  %s919_s14 = sand.u32 1, %s1161_s15  }
 0x1bc   : > { %s920_s22 = scalar_lea.sflag [#allocation10], %s919_s14 }
 0x1bd   : > { %p1034_p3 = pnand %p1037_p2, %p1259_p8 }
 0x1bf   : > { %1156 = dma.done.wait (!%p1034_p3), %s920_s22, 16  }
 0x1c0   : > { %1158 = vsyncadd (!%p1034_p3), %s920_s22, 4294967280  ;;  %s17_s20 = sadd.s32 1, %s1181_s20   ;;  %s1452_s15 = smov %s1165_s16 }
 0x1c1   : > { %p14_p5 = scmp.ge.s32.totalorder %s17_s20, 4   ;;  %s1453_s16 = smov %s1169_s17 }
 0x1c2   : > { %s1454_s17 = smov %s1265_s28  ;;  %s1455_s18 = smov %s1177_s19 }
 0x1c3   : > { %s1456_s19 = smov %s1458_s23  ;;  %16 = sbr.rel (!%p14_p5) target bundleno = 4 (0x4), region = 88 }
 0x1ca   :  { %924 = vsyncpa [#allocation10], 1 }
 0x1cb   :  { %926 = vsyncpa [#allocation10 + $0x1], 1 }

</bundles_post_ra>
